<compile_context>
chip_gen: v6e
topology: v6e:2x2x1
jax: 0.10.0
libtpu: 0.0.40
codegen_flags: <defaults>
</compile_context>

<pallas_src>
import jax
import jax.numpy as jnp
from jax.experimental import pallas as pl
from jax.experimental.pallas import tpu as pltpu


# --------------------------------------------------------------------------- #
# tiling helper
# --------------------------------------------------------------------------- #
def _pick_batch_tile(B: int) -> int:
    """Largest nice sublane-aligned batch tile that evenly divides B."""
    for tb in (1024, 512, 256, 128, 64, 32, 16, 8):
        if B % tb == 0:
            return tb
    # Fall back to the full batch (full-extent block is always legal).
    return B


# --------------------------------------------------------------------------- #
# single HF layer (matches HF.forward(v, z))
# --------------------------------------------------------------------------- #
def hf_kernel(v_ref, z_ref, out_ref):
    v = v_ref[...]                                      # (TB, L) f32
    z = z_ref[...]                                      # (TB, L) f32
    # Per-row reductions over the latent (lane) dimension.
    vTz = jnp.sum(v * z, axis=1, keepdims=True)         # (TB, 1)
    norm_sq = jnp.sum(v * v, axis=1, keepdims=True)     # (TB, 1)
    # Per-row coefficient; exact reciprocal (EUP) keeps the 1e-5 tolerance.
    coef = (2.0 * vTz) * pl.reciprocal(norm_sq, approx=False)   # (TB, 1)
    # Householder reflection update: one multiply + one subtract per tile.
    out_ref[...] = z - v * coef


def hf_forward(v, z):
    """v: (B, L), z: (B, L) -> z_new: (B, L).  Single Householder reflection."""
    assert v.shape == z.shape and v.ndim == 2
    B, L = v.shape
    TB = _pick_batch_tile(B)
    nb = B // TB
    return pl.pallas_call(
        hf_kernel,
        out_shape=jax.ShapeDtypeStruct((B, L), v.dtype),
        grid_spec=pltpu.PrefetchScalarGridSpec(
            num_scalar_prefetch=0,
            grid=(nb,),
            in_specs=[
                pl.BlockSpec((TB, L), lambda i: (i, 0)),
                pl.BlockSpec((TB, L), lambda i: (i, 0)),
            ],
            out_specs=pl.BlockSpec((TB, L), lambda i: (i, 0)),
        ),
        compiler_params=pltpu.CompilerParams(
            # Batch tiles are independent -> shard across TCs on v7x.
            dimension_semantics=("parallel",)
        ),
    )(v, z)


# --------------------------------------------------------------------------- #
# fused K-layer Householder flow (K sequential HF reflections, one kernel)
# --------------------------------------------------------------------------- #
def hf_flow_kernel(v_ref, z_ref, out_ref, z_acc):
    k = pl.program_id(1)

    @pl.when(k == 0)
    def _():
        z_acc[...] = z_ref[...]                          # load initial z once

    v = v_ref[...]                                       # (TB, L) — layer k's v
    z = z_acc[...]                                       # (TB, L) — resident in VMEM
    vTz = jnp.sum(v * z, axis=1, keepdims=True)
    norm_sq = jnp.sum(v * v, axis=1, keepdims=True)
    coef = (2.0 * vTz) * pl.reciprocal(norm_sq, approx=False)
    z_acc[...] = z - v * coef

    @pl.when(k == pl.num_programs(1) - 1)
    def _():
        out_ref[...] = z_acc[...]                        # write final z once


def hf_flow_forward(vs, z):
    """vs: (K, B, L) stacked per-layer v's, z: (B, L) -> z after K reflections.

    Single pallas_call: z stays resident in VMEM scratch across all K layers
    (no per-layer kernel launches, no per-layer HBM round trips of z).
    """
    K, B, L = vs.shape
    assert z.shape == (B, L)
    TB = _pick_batch_tile(B)
    nb = B // TB
    return pl.pallas_call(
        hf_flow_kernel,
        out_shape=jax.ShapeDtypeStruct((B, L), z.dtype),
        grid_spec=pltpu.PrefetchScalarGridSpec(
            num_scalar_prefetch=0,
            grid=(nb, K),
            in_specs=[
                # layer axis squeezed out: kernel sees (TB, L) for layer k
                pl.BlockSpec((pl.Squeezed(), TB, L), lambda i, k: (k, i, 0)),
                pl.BlockSpec((TB, L), lambda i, k: (i, 0)),
            ],
            # same output block across k -> output resident across layer axis
            out_specs=pl.BlockSpec((TB, L), lambda i, k: (i, 0)),
            scratch_shapes=[pltpu.VMEM((TB, L), jnp.float32)],
        ),
        compiler_params=pltpu.CompilerParams(
            dimension_semantics=("parallel", "arbitrary")
        ),
    )(vs, z)


# --------------------------------------------------------------------------- #
# pure-JAX references (mirror the PyTorch forward with the explicit outer product)
# --------------------------------------------------------------------------- #
def hf_reference(v, z):
    vvT = jnp.einsum("bi,bj->bij", v, v)                 # bmm(v.unsqueeze(2), v.unsqueeze(1))
    vvTz = jnp.einsum("bij,bj->bi", vvT, z)              # bmm(vvT, z.unsqueeze(2)).squeeze(2)
    norm_sq = jnp.sum(v * v, axis=1, keepdims=True)      # (B, 1), broadcast like .expand
    return z - 2.0 * vvTz / norm_sq


def hf_flow_reference(vs, z):
    for k in range(vs.shape[0]):
        z = hf_reference(vs[k], z)
    return z


# --------------------------------------------------------------------------- #
if __name__ == "__main__":
    key = jax.random.PRNGKey(0)
    B, L, K = 2, 32, 4          # batch_size x latent_size, K flow layers
    kv, kz, kf = jax.random.split(key, 3)
    v = jax.random.normal(kv, (B, L), dtype=jnp.float32)
    z = jax.random.normal(kz, (B, L), dtype=jnp.float32)
    vs = jax.random.normal(kf, (K, B, L), dtype=jnp.float32)

    # single-layer HF (matches the PyTorch module's forward)
    z_new = jax.block_until_ready(hf_forward(v, z))
    z_ref = hf_reference(v, z)
    assert z_new.shape == (B, L)
    assert jnp.allclose(z_new, z_ref, atol=1e-5, rtol=1e-5), "single-layer mismatch"

    # fused K-layer flow (z resident in VMEM across layers)
    z_flow = jax.block_until_ready(hf_flow_forward(vs, z))
    z_flow_ref = hf_flow_reference(vs, z)
    assert z_flow.shape == (B, L)
    assert jnp.allclose(z_flow, z_flow_ref, atol=1e-4, rtol=1e-4), "fused-flow mismatch"

    print("KERNEL_OK")
</pallas_src>

<mosaic_0001>
module attributes {stable_mosaic.version = 11 : i64} {
  func.func @hf_kernel(%arg0: i32, %arg1: memref<2x32xf32, #tpu.memory_space<vmem>>, %arg2: memref<2x32xf32, #tpu.memory_space<vmem>>, %arg3: memref<2x32xf32, #tpu.memory_space<vmem>>) attributes {dimension_semantics = [#tpu.dimension_semantics<parallel>], iteration_bounds = array<i64: 1>, scalar_prefetch = 0 : i64, scratch_operands = 0 : i64, tpu.core_type = #tpu.core_type<tc>, window_params = [{transform_indices = @transform_0, window_bounds = array<i64: 2, 32>}, {transform_indices = @transform_1, window_bounds = array<i64: 2, 32>}, {transform_indices = @transform_2, window_bounds = array<i64: 2, 32>}]} {
    %c0 = arith.constant 0 : index
    %c0_0 = arith.constant 0 : index
    %0 = vector.load %arg1[%c0, %c0_0] : memref<2x32xf32, #tpu.memory_space<vmem>>, vector<2x32xf32>
    %c0_1 = arith.constant 0 : index
    %c0_2 = arith.constant 0 : index
    %1 = vector.load %arg2[%c0_1, %c0_2] : memref<2x32xf32, #tpu.memory_space<vmem>>, vector<2x32xf32>
    %2 = arith.mulf %0, %1 : vector<2x32xf32>
    %cst = arith.constant dense<0.000000e+00> : vector<2xf32>
    %3 = vector.multi_reduction <add>, %2, %cst [1] : vector<2x32xf32> to vector<2xf32>
    %4 = vector.shape_cast %3 : vector<2xf32> to vector<2x1xf32>
    %5 = arith.mulf %0, %0 : vector<2x32xf32>
    %cst_3 = arith.constant dense<0.000000e+00> : vector<2xf32>
    %6 = vector.multi_reduction <add>, %5, %cst_3 [1] : vector<2x32xf32> to vector<2xf32>
    %7 = vector.shape_cast %6 : vector<2xf32> to vector<2x1xf32>
    %cst_4 = arith.constant 2.000000e+00 : f32
    %8 = vector.broadcast %cst_4 : f32 to vector<2x1xf32>
    %9 = arith.mulf %8, %4 : vector<2x1xf32>
    %10 = tpu.reciprocal %7 : vector<2x1xf32> -> vector<2x1xf32>
    %11 = arith.mulf %9, %10 : vector<2x1xf32>
    %12 = vector.broadcast %11 : vector<2x1xf32> to vector<2x32xf32>
    %13 = arith.mulf %0, %12 : vector<2x32xf32>
    %14 = arith.subf %1, %13 : vector<2x32xf32>
    %c0_5 = arith.constant 0 : index
    %c0_6 = arith.constant 0 : index
    %15 = vector.load %arg3[%c0_5, %c0_6] : memref<2x32xf32, #tpu.memory_space<vmem>>, vector<2x32xf32>
    tpu.vector_store %arg3[%c0_5, %c0_6], %14 {strides = array<i32>} : memref<2x32xf32, #tpu.memory_space<vmem>>, vector<2x32xf32>,
    return
  }
  func.func @transform_0(%arg0: i32) -> (i32, i32) {
    %c0_i32 = arith.constant 0 : i32
    %c0_i32_0 = arith.constant 0 : i32
    return %arg0, %c0_i32 : i32, i32
  }
  func.func @transform_1(%arg0: i32) -> (i32, i32) {
    %c0_i32 = arith.constant 0 : i32
    %c0_i32_0 = arith.constant 0 : i32
    return %arg0, %c0_i32 : i32, i32
  }
  func.func @transform_2(%arg0: i32) -> (i32, i32) {
    %c0_i32 = arith.constant 0 : i32
    %c0_i32_0 = arith.constant 0 : i32
    return %arg0, %c0_i32 : i32, i32
  }
}

</mosaic_0001>

<bundles_post_ra>
// kernel: tpu_custom_call.1
= control target key start
LH: loop header
LB: loop body
LE: loop exit
PB: predicated region body
PF: predicated region fallthrough
CT: control target
= control target key end

     0   :  { %7 = vsyncpa [#allocation3], 0  ;;  %s170_s0 = inlined_call_operand.hbm [shape: f32[2,32], index: 0, kind: input, shape index: {}]   ;;  %s171_s1 = inlined_call_operand.hbm [shape: f32[2,32], index: 1, kind: input, shape index: {}]   ;;  %s172_s2 = inlined_call_operand.hbm [shape: f32[2,32], index: 2, kind: output, shape index: {}]  }
   0x1   :  { %8 = vsyncpa [#allocation6], 0 }
   0x2   :  { %9 = vsyncpa [#allocation4], 0  ;;  %s140_s9 = smov [#allocation2]   ;;  %s141_s11 = smov [#allocation5]  }
   0x3   :  { %s16_s10 = sshll.u32 %s140_s9, 4  ;;  %s26_s12 = sshll.u32 %s141_s11, 4  ;;  %s17_s10 = int_to_ptr.vmem [resolvable:$true] %s16_s10  ;;  %s27_s12 = int_to_ptr.vmem [resolvable:$true] %s26_s12 }
   0x4   :  { %s82_s13 = scalar_lea.vmem %s17_s10, 32  ;;  %p87_p1 = scmp.lt.s32.totalorder %s17_s10, %s17_s10 }
   0x5   :  { %p83_p0 = scmp.ne.s32.totalorder %s17_s10, %s82_s13  ;;  %p88_p2 = scmp.lt.s32.totalorder %s82_s13, %s82_s13 }
   0x7   :  { %p89_p3 = por %p88_p2, %p87_p1 }
   0x9   :  { %p90_p4 = pnand %p89_p3, %p83_p0 }
   0xb   :  { %93 = shalt.err (!%p90_p4)
}
   0xc   :  { %19 = dma.hbm_to_vmem [thread:$0]  %s170_s0, 32, %s17_s10, [#allocation3]  }
   0xd   :  { %s102_s16 = scalar_lea.vmem %s27_s12, 32  ;;  %p107_p6 = scmp.lt.s32.totalorder %s27_s12, %s27_s12 }
   0xe   :  { %p103_p5 = scmp.ne.s32.totalorder %s27_s12, %s102_s16  ;;  %p108_p7 = scmp.lt.s32.totalorder %s102_s16, %s102_s16 }
  0x10   :  { %p109_p8 = por %p108_p7, %p107_p6 }
  0x12   :  { %p110_p9 = pnand %p109_p8, %p103_p5 }
  0x14   :  { %113 = shalt.err (!%p110_p9)
}
  0x15   :  { %29 = dma.hbm_to_vmem [thread:$0]  %s171_s1, 32, %s27_s12, [#allocation6]  }
  0x16   :  { %134 = dma.done.wait [#allocation3], 32  }
  0x17   :  { %135 = vsyncadd [#allocation3], 4294967264 }
  0x18   :  { %136 = dma.done.wait [#allocation6], 32  }
  0x19   :  { %137 = vsyncadd [#allocation6], 4294967264  ;;  %v36_v0 = vld [vmem:[#allocation2] sm:$0x3]  ;;  %vm39_vm0 = vcmask 254976   ;;  %s142_s0 = smov [#allocation7]  }
  0x1a   :  { %v37_v1 = vld [vmem:[#allocation5] sm:$0x3]  ;;  %v43_v2 = vmul.f32 %v36_v0, %v36_v0  ;;  %s59_s1 = sshll.u32 %s142_s0, 4  ;;  %s60_s1 = int_to_ptr.vmem [resolvable:$true] %s59_s1 }
  0x1b   :  { %v38_v3 = vmul.f32 %v37_v1, %v36_v0  ;;  %s114_s19 = scalar_lea.vmem %s60_s1, 32  ;;  %p119_p11 = scmp.lt.s32.totalorder %s60_s1, %s60_s1 }
  0x1c   :  { %v44_v4 = vsel %vm39_vm0, %v43_v2, 0.0  ;;  %p115_p10 = scmp.ne.s32.totalorder %s60_s1, %s114_s19  ;;  %p120_p12 = scmp.lt.s32.totalorder %s114_s19, %s114_s19 }
  0x1d   :  { %45 = vadd.xlane.f32.xlu0 %v44_v4  ;;  %v40_v5 = vsel %vm39_vm0, %v38_v3, 0.0 }
  0x1e   :  { %p121_p13 = por %p120_p12, %p119_p11 }
  0x20   :  { %p122_p0 = pnand %p121_p13, %p115_p10 }
  0x21   :  { %41 = vadd.xlane.f32.xlu0 %v40_v5 }
  0xa6   :  { %v46_v6 = vpop.xlane.xlu0 %45 }
  0xa7   :  { %72 = vrcp.f32 %v46_v6 }
  0xaa   :  { %v42_v7 = vpop.xlane.xlu0 %41 }
  0xab   :  { %v47_v8 = vmul.f32 2.0, %v42_v7 }
  0xb4   :  { %v73_v9 = vpop.eup %72 }
  0xb5   :  { %v49_v10 = vmul.f32 %v73_v9, %v47_v8 }
  0xb7   :  { %v50_v11 = vmul.f32 %v49_v10, %v36_v0 }
  0xb9   :  { %v51_v12 = vsub.f32 %v37_v1, %v50_v11 }
  0xbb   :  { %52 = vst.msk [vmem:[#allocation7] sm:$0x3] %vm39_vm0, %v51_v12 }
  0xbc   :  { %125 = shalt.err (!%p122_p0)
}
  0xbd   :  { %62 = dma.vmem_to_hbm [thread:$0]  %s60_s1, 32, %s172_s2, [#allocation4]  }
  0xbe   :  { %138 = dma.done.wait [#allocation4], 32  }
  0xbf   :  { %139 = vsyncadd [#allocation4], 4294967264 }
  0xc0   :  { %66 = vsyncpa [#allocation3], 1 }
  0xc1   :  { %67 = vsyncpa [#allocation6], 1 }
  0xc2   :  { %68 = vsyncpa [#allocation4], 1 }

</bundles_post_ra>
